<compile_context>
chip_gen: v6e
topology: v6e:2x2x1
jax: 0.10.0
libtpu: 0.0.40
codegen_flags: <defaults>
</compile_context>

<pallas_src>
import functools

import jax
import jax.numpy as jnp
from jax.experimental import pallas as pl
from jax.experimental.pallas import tpu as pltpu


def _round_up(v, m):
    return ((v + m - 1) // m) * m


def _patch_embed_kernel(x_ref, w_ref, b_ref, o_ref):
    # x_ref: (tm, K) patches, w_ref: (K, tn), b_ref: (1, tn) f32, o_ref: (tm, tn).
    # MXU matmul with f32 accumulate; bias add in f32 on the VPU; cast on store.
    acc = jnp.dot(x_ref[...], w_ref[...], preferred_element_type=jnp.float32)
    o_ref[...] = (acc + b_ref[...]).astype(o_ref.dtype)


def _choose_tiles(M, K, N, in_bytes, out_bytes):
    # N tile: full N when it is not lane-aligned (avoids padding + slice) or small;
    # otherwise a 128-multiple divisor so the weight tile stays VMEM-resident.
    if N % 128 != 0 or N <= 2048:
        tn = N
    else:
        tn = next(t for t in (1024, 512, 256, 128) if N % t == 0)

    # M tile: big enough to amortize the ~0.35us per-step overhead, shrunk until the
    # double-buffered working set fits a ~24 MiB VMEM budget.
    tm = 512 if M >= 512 else _round_up(M, 8)
    budget = 24 * 1024 * 1024
    while tm > 64:
        per_step = 2 * (tm * K * in_bytes + K * tn * in_bytes + tm * tn * out_bytes)
        if per_step <= budget:
            break
        tm //= 2
    tm = max(8, _round_up(tm, 8))
    return tm, tn


@functools.partial(jax.jit, static_argnames=("patch_size", "compute_dtype"))
def patch_embedding(x, weight, bias, *, patch_size, compute_dtype=jnp.bfloat16):
    """x: (B, C_in, H, W) NCHW.
    weight: (embed_dim, C_in, p, p)   (PyTorch Conv2d weight layout)
    bias:   (embed_dim,)
    returns (B, H//p, W//p, embed_dim) -- matches permute(0, 2, 3, 1) in PyTorch.
    """
    B, C, H, W = x.shape
    p = patch_size
    N = weight.shape[0]
    Hp, Wp = H // p, W // p

    M = B * Hp * Wp
    K = C * p * p

    # --- glue (plain JAX): patchify input, flatten weight ---
    # Cast to the MXU compute dtype BEFORE patchify so the materialized patch matrix
    # is half-width, halving its HBM write/read traffic.
    # TODO(synk): the patchify transpose still materializes the (M, K) patch matrix
    # in HBM once; an NHWC input layout or in-kernel strip-wise patchify would
    # remove that extra round-trip.
    xc = x.astype(compute_dtype)
    patches = xc.reshape(B, C, Hp, p, Wp, p).transpose(0, 2, 4, 1, 3, 5).reshape(M, K)
    w_mat = weight.reshape(N, K).T.astype(compute_dtype)      # (K, N)
    b_mat = bias.reshape(1, N).astype(jnp.float32)            # (1, N)

    out_dtype = x.dtype
    in_bytes = jnp.dtype(compute_dtype).itemsize
    out_bytes = jnp.dtype(out_dtype).itemsize
    tm, tn = _choose_tiles(M, K, N, in_bytes, out_bytes)
    # TODO(synk): for pathologically large K (C_in*p*p in the tens of thousands) a
    # K-reduction grid axis + f32 VMEM accumulator would be needed; patch-embedding
    # K is small in practice so it is kept un-tiled here.

    # Only the M axis ever needs padding (grid divisibility); zero rows are sliced
    # off after the call.
    M_pad = _round_up(M, tm)
    if M_pad > M:
        patches = jnp.pad(patches, ((0, M_pad - M), (0, 0)))

    grid = (M_pad // tm, N // tn)

    out = pl.pallas_call(
        _patch_embed_kernel,
        out_shape=jax.ShapeDtypeStruct((M_pad, N), out_dtype),
        grid=grid,
        in_specs=[
            pl.BlockSpec((tm, K), lambda i, j: (i, 0)),    # patch tile
            pl.BlockSpec((K, tn), lambda i, j: (0, j)),    # weight (resident over M)
            pl.BlockSpec((1, tn), lambda i, j: (0, j)),    # bias   (resident over M)
        ],
        out_specs=pl.BlockSpec((tm, tn), lambda i, j: (i, j)),
        compiler_params=pltpu.CompilerParams(
            dimension_semantics=("parallel", "parallel"),
            vmem_limit_bytes=32 * 1024 * 1024,
        ),
    )(patches, w_mat, b_mat)

    if M_pad > M:
        out = out[:M]
    return out.reshape(B, Hp, Wp, N)


if __name__ == "__main__":
    # Small deterministic example consistent with the module.
    B, C_in, H, W = 2, 4, 16, 16
    patch_size = 4
    embed_dim = 32

    key = jax.random.PRNGKey(0)
    kx, kw, kb = jax.random.split(key, 3)

    x = jax.random.normal(kx, (B, C_in, H, W), dtype=jnp.float32)
    weight = jax.random.normal(
        kw, (embed_dim, C_in, patch_size, patch_size), dtype=jnp.float32
    ) * 0.05
    bias = jax.random.normal(kb, (embed_dim,), dtype=jnp.float32) * 0.05

    # Reference: lax conv (NCHW, stride = kernel = patch_size), permuted like the
    # PyTorch module's permute(0, 2, 3, 1).
    ref = jax.lax.conv_general_dilated(
        x, weight,
        window_strides=(patch_size, patch_size),
        padding="VALID",
        dimension_numbers=("NCHW", "OIHW", "NCHW"),
    ) + bias[None, :, None, None]
    ref = jnp.transpose(ref, (0, 2, 3, 1))

    # f32 compute path: tight check of the kernel structure.
    out_f32 = patch_embedding(
        x, weight, bias, patch_size=patch_size, compute_dtype=jnp.float32
    )
    out_f32 = jax.block_until_ready(out_f32)
    assert out_f32.shape == (B, H // patch_size, W // patch_size, embed_dim), out_f32.shape
    assert jnp.allclose(out_f32, ref, atol=1e-4, rtol=1e-4), "f32 mismatch vs reference"

    # bf16 compute path (default, MXU-optimized): looser tolerance.
    out_bf16 = patch_embedding(x, weight, bias, patch_size=patch_size)
    out_bf16 = jax.block_until_ready(out_bf16)
    assert out_bf16.shape == (B, H // patch_size, W // patch_size, embed_dim), out_bf16.shape
    assert jnp.allclose(out_bf16, ref, atol=3e-2, rtol=3e-2), "bf16 mismatch vs reference"

    print("KERNEL_OK")
</pallas_src>

<mosaic_0001>
module attributes {stable_mosaic.version = 11 : i64} {
  func.func @_patch_embed_kernel(%arg0: i32, %arg1: i32, %arg2: memref<32x64xf32, #tpu.memory_space<vmem>>, %arg3: memref<64x32xf32, #tpu.memory_space<vmem>>, %arg4: memref<1x32xf32, #tpu.memory_space<vmem>>, %arg5: memref<32x32xf32, #tpu.memory_space<vmem>>) attributes {dimension_semantics = [#tpu.dimension_semantics<parallel>, #tpu.dimension_semantics<parallel>], iteration_bounds = array<i64: 1, 1>, scalar_prefetch = 0 : i64, scratch_operands = 0 : i64, tpu.core_type = #tpu.core_type<tc>, window_params = [{transform_indices = @transform_0, window_bounds = array<i64: 32, 64>}, {transform_indices = @transform_1, window_bounds = array<i64: 64, 32>}, {transform_indices = @transform_2, window_bounds = array<i64: 1, 32>}, {transform_indices = @transform_3, window_bounds = array<i64: 32, 32>}]} {
    %c0 = arith.constant 0 : index
    %c0_0 = arith.constant 0 : index
    %0 = vector.load %arg2[%c0, %c0_0] : memref<32x64xf32, #tpu.memory_space<vmem>>, vector<32x64xf32>
    %c0_1 = arith.constant 0 : index
    %c0_2 = arith.constant 0 : index
    %1 = vector.load %arg3[%c0_1, %c0_2] : memref<64x32xf32, #tpu.memory_space<vmem>>, vector<64x32xf32>
    %cst = arith.constant dense<0.000000e+00> : vector<32x32xf32>
    %2 = tpu.matmul %0, %1, %cst {dimension_numbers = #tpu.dot_dimension_numbers<[1], [0], [0], [1], [0, 0, 1, 1], [], []>} : vector<32x64xf32>, vector<64x32xf32>, vector<32x32xf32> -> vector<32x32xf32>
    %c0_3 = arith.constant 0 : index
    %c0_4 = arith.constant 0 : index
    %3 = vector.load %arg4[%c0_3, %c0_4] : memref<1x32xf32, #tpu.memory_space<vmem>>, vector<1x32xf32>
    %4 = vector.broadcast %3 : vector<1x32xf32> to vector<32x32xf32>
    %5 = arith.addf %2, %4 : vector<32x32xf32>
    %c0_5 = arith.constant 0 : index
    %c0_6 = arith.constant 0 : index
    %6 = vector.load %arg5[%c0_5, %c0_6] : memref<32x32xf32, #tpu.memory_space<vmem>>, vector<32x32xf32>
    tpu.vector_store %arg5[%c0_5, %c0_6], %5 {strides = array<i32>} : memref<32x32xf32, #tpu.memory_space<vmem>>, vector<32x32xf32>,
    return
  }
  func.func @transform_0(%arg0: i32, %arg1: i32) -> (i32, i32) {
    %c0_i32 = arith.constant 0 : i32
    %c0_i32_0 = arith.constant 0 : i32
    return %arg0, %c0_i32 : i32, i32
  }
  func.func @transform_1(%arg0: i32, %arg1: i32) -> (i32, i32) {
    %c0_i32 = arith.constant 0 : i32
    %c0_i32_0 = arith.constant 0 : i32
    return %c0_i32, %arg1 : i32, i32
  }
  func.func @transform_2(%arg0: i32, %arg1: i32) -> (i32, i32) {
    %c0_i32 = arith.constant 0 : i32
    %c0_i32_0 = arith.constant 0 : i32
    return %c0_i32, %arg1 : i32, i32
  }
  func.func @transform_3(%arg0: i32, %arg1: i32) -> (i32, i32) {
    %c0_i32 = arith.constant 0 : i32
    return %arg0, %arg1 : i32, i32
  }
}

</mosaic_0001>

<bundles_post_ra>
// kernel: patch_embedding.1
= control target key start
LH: loop header
LB: loop body
LE: loop exit
PB: predicated region body
PF: predicated region fallthrough
CT: control target
= control target key end

     0   :  { %s298_s0 = inlined_call_operand.vmem [shape: f32[32,64], index: 0, kind: input, shape index: {}]   ;;  %s299_s1 = inlined_call_operand.vmem [shape: f32[64,32], index: 1, kind: input, shape index: {}]   ;;  %s300_s2 = inlined_call_operand.vmem [shape: f32[1,32], index: 2, kind: input, shape index: {}]   ;;  %s301_s3 = inlined_call_operand.hbm [shape: f32[32,32], index: 3, kind: output, shape index: {}]  }
   0x1   :  { %v26_v0 = vld [vmem:[%s299_s1 + $0x38] sm:$0xff]  ;;  %v25_v1 = vld [vmem:[%s299_s1 + $0x30] sm:$0xff]  ;;  %v24_v2 = vld [vmem:[%s299_s1 + $0x28] sm:$0xff] }
   0x2   :  { %170 = vmatprep.subr.mxu0 %v26_v0  ;;  %192 = vmatprep.subr.mxu1 %v26_v0  ;;  %v23_v3 = vld [vmem:[%s299_s1 + $0x20] sm:$0xff] }
   0x3   :  { %171 = vmatpush3.msra.mxu0 %v26_v0  ;;  %200 = vmatpush3.msra.mxu1 %v26_v0 }
   0x4   :  { %172 = vmatprep.subr.mxu0 %v25_v1  ;;  %193 = vmatprep.subr.mxu1 %v25_v1 }
   0x5   :  { %173 = vmatpush3.msra.mxu0 %v25_v1  ;;  %201 = vmatpush3.msra.mxu1 %v25_v1 }
   0x6   :  { %8 = vsyncpa [#allocation3], 0  ;;  %174 = vmatprep.subr.mxu0 %v24_v2  ;;  %194 = vmatprep.subr.mxu1 %v24_v2  ;;  %v22_v4 = vld [vmem:[%s299_s1 + $0x18] sm:$0xff]  ;;  %v21_v5 = vld [vmem:[%s299_s1 + $0x10] sm:$0xff]  ;;  %vm34_vm0 = vcmask 523264   ;;  %s233_s10 = smov [#allocation2]  }
   0x7   :  { %175 = vmatpush3.msra.mxu0 %v24_v2  ;;  %202 = vmatpush3.msra.mxu1 %v24_v2  ;;  %v20_v6 = vld [vmem:[%s299_s1 + $0x8] sm:$0xff]  ;;  %v19_v7 = vld [vmem:[%s299_s1] sm:$0xff]  ;;  %v17_v9 = vld [vmem:[%s298_s0 + $0x10] sm:$0xff]  ;;  %s142_s11 = sshll.u32 %s233_s10, 4  ;;  %vm132_vm1 = vcmask 261120   ;;  %s143_s11 = int_to_ptr.vmem [resolvable:$true] %s142_s11 }
   0x8   :  { %176 = vmatprep.subr.mxu0 %v23_v3  ;;  %195 = vmatprep.subr.mxu1 %v23_v3  ;;  %v15_v8 = vld [vmem:[%s298_s0] sm:$0xff]  ;;  %v16_v10 = vld [vmem:[%s298_s0 + $0x8] sm:$0xff]  ;;  %v18_v11 = vld [vmem:[%s298_s0 + $0x18] sm:$0xff]  ;;  %s211_s0 = scalar_lea.vmem %s143_s11, 512  ;;  %p216_p1 = scmp.lt.s32.totalorder %s143_s11, %s143_s11 }
   0x9   :  { %177 = vmatpush3.msra.mxu0 %v23_v3  ;;  %203 = vmatpush3.msra.mxu1 %v23_v3  ;;  %v153_v12 = vld [vmem:[%s300_s2] ss:$0 sm:$0xff]  ;;  %p212_p0 = scmp.ne.s32.totalorder %s143_s11, %s211_s0  ;;  %p217_p2 = scmp.lt.s32.totalorder %s211_s0, %s211_s0 }
   0xa   :  { %178 = vmatprep.subr.mxu0 %v22_v4  ;;  %196 = vmatprep.subr.mxu1 %v22_v4 }
   0xb   :  { %179 = vmatpush3.msra.mxu0 %v22_v4  ;;  %204 = vmatpush3.msra.mxu1 %v22_v4  ;;  %p218_p3 = por %p217_p2, %p216_p1 }
   0xc   :  { %180 = vmatprep.subr.mxu0 %v21_v5  ;;  %197 = vmatprep.subr.mxu1 %v21_v5 }
   0xd   :  { %181 = vmatpush3.msra.mxu0 %v21_v5  ;;  %205 = vmatpush3.msra.mxu1 %v21_v5  ;;  %p219_p4 = pnand %p218_p3, %p212_p0 }
   0xe   :  { %182 = vmatprep.subr.mxu0 %v20_v6  ;;  %198 = vmatprep.subr.mxu1 %v20_v6 }
   0xf   :  { %183 = vmatpush3.msra.mxu0 %v20_v6  ;;  %206 = vmatpush3.msra.mxu1 %v20_v6 }
  0x10   :  { %184 = vmatprep.subr.mxu0 %v19_v7  ;;  %199 = vmatprep.subr.mxu1 %v19_v7 }
  0x11   :  { %185 = vmatpush3.msra.mxu0 %v19_v7  ;;  %207 = vmatpush3.msra.mxu1 %v19_v7 }
  0x12   :  { %186 = vmatprep.mubr.msk.f32.mxu0 %vm34_vm0, %v15_v8  ;;  %189 = vmatprep.mubr.msk.f32.mxu1 %vm34_vm0, %v17_v9 }
  0x13   :  { %187 = vmatmul.mubr.msk.f32.vlgmr.msra.gmra.mxu0 %vm34_vm0, %v16_v10  ;;  %190 = vmatmul.mubr.msk.f32.vlgmr.msra.gmra.mxu1 %vm34_vm0, %v18_v11 }
  0xd3   :  { %v188_v13 = vpop.f32.mrf.mxu0  ;;  %v191_v14 = vpop.f32.mrf.mxu1 }
  0xd4   :  { %v119_v15 = vadd.f32 %v188_v13, %v153_v12  ;;  %v129_v16 = vadd.f32 %v191_v14, %v153_v12 }
  0xd5   :  { %v113_v17 = vpop.f32.mrf.mxu0  ;;  %v123_v18 = vpop.f32.mrf.mxu1 }
  0xd6   :  { %134 = vst.msk [vmem:[#allocation2 + $0x8] sm:$0xff] %vm132_vm1, %v119_v15  ;;  %136 = vst.msk [vmem:[#allocation2 + $0x18] sm:$0xff] %vm132_vm1, %v129_v16  ;;  %v114_v19 = vadd.f32 %v153_v12, %v113_v17  ;;  %v124_v20 = vadd.f32 %v153_v12, %v123_v18 }
  0xd8   :  { %133 = vst.msk [vmem:[#allocation2] sm:$0xff] %vm132_vm1, %v114_v19  ;;  %135 = vst.msk [vmem:[#allocation2 + $0x10] sm:$0xff] %vm132_vm1, %v124_v20 }
  0xd9   :  { %222 = shalt.err (!%p219_p4)
}
  0xda   :  { %s234_s2 = smov 128   ;;  %s235_s12 = smov 8  }
  0xdb   :  { %148 = dma.vmem_to_hbm [thread:$0]  %s143_s11, 512, %s301_s3, [#allocation3], %s234_s2, %s234_s2, %s235_s12  }
  0xdc   :  { %231 = dma.done.wait [#allocation3], 512  }
  0xdd   :  { %232 = vsyncadd [#allocation3], 4294966784 }
  0xde   :  { %152 = vsyncpa [#allocation3], 1 }

</bundles_post_ra>
